<compile_context>
chip_gen: v7x
topology: tpu7x:2x2x1
jax: 0.10.0
libtpu: 0.0.40
codegen_flags: <defaults>
</compile_context>

<pallas_src>
import functools

import jax
import jax.numpy as jnp
from jax.experimental import pallas as pl
from jax.experimental.pallas import tpu as pltpu


def _specaug_kernel(fs_ref, fw_ref, ts_ref, tw_ref, x_ref, o_ref, *,
                    bb, n_freq, n_time, apply_freq, apply_time):
    """Processes `bb` batch rows per grid step.

    fs_ref/fw_ref : (Bp*n_freq,) int32 SMEM — freq-mask starts / widths (flat)
    ts_ref/tw_ref : (Bp*n_time,) int32 SMEM — time-mask starts / widths (flat)
    x_ref / o_ref : (bb, F, T)  VMEM tiles of the input / output
    """
    g = pl.program_id(0)
    _, F, T = x_ref.shape

    # Separable mask: small 1-D (per-row / per-column) masks, broadcast-OR'd
    # once over the full (F, T) tile.
    row = jax.lax.broadcasted_iota(jnp.int32, (F, 1), 0)   # freq index
    col = jax.lax.broadcasted_iota(jnp.int32, (1, T), 1)   # time index
    zero = jnp.zeros((), dtype=x_ref.dtype)

    for i in range(bb):                      # bb is a small static constant
        b = g * bb + i
        fmask = jnp.zeros((F, 1), dtype=jnp.bool_)
        tmask = jnp.zeros((1, T), dtype=jnp.bool_)
        if apply_freq:
            for j in range(n_freq):
                f0 = fs_ref[b * n_freq + j]
                w = fw_ref[b * n_freq + j]
                fmask = fmask | ((row >= f0) & (row < f0 + w))
        if apply_time:
            for j in range(n_time):
                t0 = ts_ref[b * n_time + j]
                w = tw_ref[b * n_time + j]
                tmask = tmask | ((col >= t0) & (col < t0 + w))
        mask = fmask | tmask                 # (F, T) via broadcast
        o_ref[i] = jnp.where(mask, zero, x_ref[i])


def _tpu_block_budget():
    """Generation-aware (block_bytes_cap, vmem_limit_bytes)."""
    cap, limit = 4 << 20, 32 << 20          # safe default: v7x (64 MiB VMEM) / unknown
    try:
        kind = jax.devices()[0].device_kind.lower()
    except Exception:
        kind = ""
    if "v5" in kind:
        cap, limit = 6 << 20, 32 << 20      # v5e: modest blocks are already fine
    elif "v6" in kind:
        cap, limit = 10 << 20, 64 << 20     # v6e: 128 MiB VMEM, bigger blocks are free
    return cap, limit


def _pick_rows_per_block(B, slab_bytes, cap_bytes,
                         target_steps=8, min_block_bytes=1 << 20,
                         max_unroll=32):
    """Rows of (F, T) per grid step: big blocks, but enough steps to pipeline."""
    slab = max(1, slab_bytes)
    rows_cap = max(1, cap_bytes // slab)
    bb = min(B, rows_cap)
    if -(-B // bb) < target_steps:
        # Too few grid steps for the DMA pipeline: shrink toward ~target_steps
        # steps, but keep blocks >= ~min_block_bytes.
        rows_for_steps = max(1, -(-B // target_steps))
        rows_min = max(1, min_block_bytes // slab)
        bb = max(min(rows_for_steps, bb), min(rows_min, bb))
    return max(1, min(bb, max_unroll, B))


def spec_augment(x, key, *, freq_masks=2, min_freq=0, max_freq=4,
                 time_masks=2, min_time=0, max_time=4,
                 rows_per_block=None, donate_x=False):
    """Pallas implementation of SpecAugment.forward.

    Matches PyTorch semantics:
      w  ~ randint(min, max+1)            (inclusive max, per batch per mask)
      f0 ~ randint(0, max(1, F - w))      (exclusive high)
      t0 ~ randint(0, max(1, T - w))
      out = x.masked_fill(mask, 0)

    Set donate_x=True only when the caller actually donates x (e.g. via
    jax.jit donate_argnums); otherwise aliasing just adds a defensive copy.
    """
    assert 0 <= min_freq <= max_freq
    assert 0 <= min_time <= max_time
    B, F, T = x.shape
    itemsize = x.dtype.itemsize

    # TODO(synk): torch samples mask params with the global torch RNG inside
    # forward(); here they are sampled with jax.random in the wrapper and fed
    # to the kernel via scalar prefetch (same distribution, different stream).
    k_fw, k_fs, k_tw, k_ts = jax.random.split(key, 4)

    # Pad mask counts to >= 1 so SMEM arrays are non-empty; zero widths are no-ops.
    nf = max(freq_masks, 1)
    nt = max(time_masks, 1)

    fw = jax.random.randint(k_fw, (B, nf), min_freq, max_freq + 1, dtype=jnp.int32)
    tw = jax.random.randint(k_tw, (B, nt), min_time, max_time + 1, dtype=jnp.int32)
    if freq_masks == 0:
        fw = jnp.zeros_like(fw)
    if time_masks == 0:
        tw = jnp.zeros_like(tw)
    fs = jax.random.randint(k_fs, (B, nf), 0, jnp.maximum(1, F - fw), dtype=jnp.int32)
    ts = jax.random.randint(k_ts, (B, nt), 0, jnp.maximum(1, T - tw), dtype=jnp.int32)
    params = (fs, fw, ts, tw)                # unpadded, for the caller / reference

    # --- block sizing (generation-aware, pipeline-friendly) -------------------
    block_bytes_cap, vmem_limit = _tpu_block_budget()
    slab = F * T * itemsize                  # bytes per batch row
    if rows_per_block is not None:
        bb = max(1, min(int(rows_per_block), B))
    else:
        bb = _pick_rows_per_block(B, slab, block_bytes_cap)
    steps = -(-B // bb)                      # cdiv: ragged final block is OK
    Bp = steps * bb

    # Zero-pad the scalar arrays to the grid extent so SMEM reads for the
    # ragged final block stay in bounds (zero width => empty mask).
    if Bp != B:
        pad = ((0, Bp - B), (0, 0))
        fs_p, fw_p = jnp.pad(fs, pad), jnp.pad(fw, pad)
        ts_p, tw_p = jnp.pad(ts, pad), jnp.pad(tw, pad)
    else:
        fs_p, fw_p, ts_p, tw_p = fs, fw, ts, tw

    kernel = functools.partial(
        _specaug_kernel, bb=bb, n_freq=nf, n_time=nt,
        apply_freq=(freq_masks > 0), apply_time=(time_masks > 0))

    grid_spec = pltpu.PrefetchScalarGridSpec(
        num_scalar_prefetch=4,               # flattened fs, fw, ts, tw land in SMEM
        grid=(steps,),
        # Last two block dims equal the full array dims (F, T) -> legal even
        # when T is not a multiple of 128; no wrapper pad/slice needed.
        in_specs=[pl.BlockSpec((bb, F, T), lambda g, *prefetch: (g, 0, 0))],
        out_specs=pl.BlockSpec((bb, F, T), lambda g, *prefetch: (g, 0, 0)),
    )
    cost = pl.CostEstimate(
        flops=B * F * T,
        transcendentals=0,
        bytes_accessed=2 * B * F * T * itemsize,
    )
    call_kwargs = dict(
        grid_spec=grid_spec,
        out_shape=jax.ShapeDtypeStruct((B, F, T), x.dtype),
        compiler_params=pltpu.CompilerParams(
            dimension_semantics=("parallel",),
            vmem_limit_bytes=vmem_limit),
        cost_estimate=cost,
    )
    if donate_x:
        # x is flat input index 4 (after the 4 scalar-prefetch operands).
        call_kwargs["input_output_aliases"] = {4: 0}

    out = pl.pallas_call(kernel, **call_kwargs)(
        fs_p.reshape(-1), fw_p.reshape(-1), ts_p.reshape(-1), tw_p.reshape(-1), x)
    return out, params


def _reference(x, fs, fw, ts, tw, freq_masks, time_masks):
    """Pure-JAX reference for correctness checking."""
    B, F, T = x.shape
    row = jnp.arange(F)[None, :, None]
    col = jnp.arange(T)[None, None, :]
    mask = jnp.zeros((B, F, T), dtype=bool)
    if freq_masks > 0:
        for j in range(fs.shape[1]):
            f0 = fs[:, j][:, None, None]
            w = fw[:, j][:, None, None]
            mask = mask | ((row >= f0) & (row < f0 + w))
    if time_masks > 0:
        for j in range(ts.shape[1]):
            t0 = ts[:, j][:, None, None]
            w = tw[:, j][:, None, None]
            mask = mask | ((col >= t0) & (col < t0 + w))
    return jnp.where(mask, jnp.zeros((), x.dtype), x)


if __name__ == "__main__":
    key = jax.random.PRNGKey(0)
    k_x, k_aug = jax.random.split(key)

    B, F, T = 5, 16, 48          # T deliberately NOT a multiple of 128
    x = jax.random.normal(k_x, (B, F, T), dtype=jnp.float32)

    freq_masks, time_masks = 2, 2

    # 1) Default block sizing (single block covers all rows at this tiny size).
    out1, (fs, fw, ts, tw) = spec_augment(
        x, k_aug,
        freq_masks=freq_masks, min_freq=0, max_freq=4,
        time_masks=time_masks, min_time=0, max_time=6,
    )
    out1 = jax.block_until_ready(out1)

    # 2) Forced small blocks -> cdiv grid with a ragged final block.
    out2, _ = spec_augment(
        x, k_aug,
        freq_masks=freq_masks, min_freq=0, max_freq=4,
        time_masks=time_masks, min_time=0, max_time=6,
        rows_per_block=2,
    )
    out2 = jax.block_until_ready(out2)

    ref = _reference(x, fs, fw, ts, tw, freq_masks, time_masks)
    assert out1.shape == x.shape and out1.dtype == x.dtype
    assert jnp.array_equal(out1, ref), "Pallas output (default blocks) mismatch"
    assert jnp.array_equal(out2, ref), "Pallas output (ragged grid) mismatch"

    print("KERNEL_OK")
</pallas_src>

<mosaic_0001>
module attributes {stable_mosaic.version = 11 : i64} {
  func.func @_specaug_kernel(%arg0: i32, %arg1: memref<10xi32, #tpu.memory_space<smem>>, %arg2: memref<10xi32, #tpu.memory_space<smem>>, %arg3: memref<10xi32, #tpu.memory_space<smem>>, %arg4: memref<10xi32, #tpu.memory_space<smem>>, %arg5: memref<5x16x48xf32, #tpu.memory_space<vmem>>, %arg6: memref<5x16x48xf32, #tpu.memory_space<vmem>>) attributes {dimension_semantics = [#tpu.dimension_semantics<parallel>], iteration_bounds = array<i64: 1>, scalar_prefetch = 4 : i64, scratch_operands = 0 : i64, tpu.core_type = #tpu.core_type<tc>, window_params = [{transform_indices = @transform_0, window_bounds = array<i64: 5, 16, 48>}, {transform_indices = @transform_1, window_bounds = array<i64: 5, 16, 48>}]} {
    %0 = tpu.iota {dimensions = array<i32: 0>} : vector<16x1xi32>
    %1 = tpu.iota {dimensions = array<i32: 1>} : vector<1x48xi32>
    %c5_i32 = arith.constant 5 : i32
    %2 = arith.muli %arg0, %c5_i32 : i32
    %c0_i32 = arith.constant 0 : i32
    %3 = arith.addi %2, %c0_i32 : i32
    %false = arith.constant false
    %4 = vector.broadcast %false : i1 to vector<16x1xi1>
    %false_0 = arith.constant false
    %5 = vector.broadcast %false_0 : i1 to vector<1x48xi1>
    %c2_i32 = arith.constant 2 : i32
    %6 = arith.muli %3, %c2_i32 : i32
    %c0_i32_1 = arith.constant 0 : i32
    %7 = arith.addi %6, %c0_i32_1 : i32
    %8 = arith.index_cast %7 : i32 to index
    %9 = memref.load %arg1[%8] : memref<10xi32, #tpu.memory_space<smem>>
    %c2_i32_2 = arith.constant 2 : i32
    %10 = arith.muli %3, %c2_i32_2 : i32
    %c0_i32_3 = arith.constant 0 : i32
    %11 = arith.addi %10, %c0_i32_3 : i32
    %12 = arith.index_cast %11 : i32 to index
    %13 = memref.load %arg2[%12] : memref<10xi32, #tpu.memory_space<smem>>
    %14 = vector.broadcast %9 : i32 to vector<16x1xi32>
    %15 = arith.cmpi sge, %0, %14 : vector<16x1xi32>
    %16 = arith.addi %9, %13 : i32
    %17 = vector.broadcast %16 : i32 to vector<16x1xi32>
    %18 = arith.cmpi slt, %0, %17 : vector<16x1xi32>
    %19 = arith.andi %15, %18 : vector<16x1xi1>
    %20 = arith.ori %4, %19 : vector<16x1xi1>
    %c2_i32_4 = arith.constant 2 : i32
    %21 = arith.muli %3, %c2_i32_4 : i32
    %c1_i32 = arith.constant 1 : i32
    %22 = arith.addi %21, %c1_i32 : i32
    %23 = arith.index_cast %22 : i32 to index
    %24 = memref.load %arg1[%23] : memref<10xi32, #tpu.memory_space<smem>>
    %c2_i32_5 = arith.constant 2 : i32
    %25 = arith.muli %3, %c2_i32_5 : i32
    %c1_i32_6 = arith.constant 1 : i32
    %26 = arith.addi %25, %c1_i32_6 : i32
    %27 = arith.index_cast %26 : i32 to index
    %28 = memref.load %arg2[%27] : memref<10xi32, #tpu.memory_space<smem>>
    %29 = vector.broadcast %24 : i32 to vector<16x1xi32>
    %30 = arith.cmpi sge, %0, %29 : vector<16x1xi32>
    %31 = arith.addi %24, %28 : i32
    %32 = vector.broadcast %31 : i32 to vector<16x1xi32>
    %33 = arith.cmpi slt, %0, %32 : vector<16x1xi32>
    %34 = arith.andi %30, %33 : vector<16x1xi1>
    %35 = arith.ori %20, %34 : vector<16x1xi1>
    %c2_i32_7 = arith.constant 2 : i32
    %36 = arith.muli %3, %c2_i32_7 : i32
    %c0_i32_8 = arith.constant 0 : i32
    %37 = arith.addi %36, %c0_i32_8 : i32
    %38 = arith.index_cast %37 : i32 to index
    %39 = memref.load %arg3[%38] : memref<10xi32, #tpu.memory_space<smem>>
    %c2_i32_9 = arith.constant 2 : i32
    %40 = arith.muli %3, %c2_i32_9 : i32
    %c0_i32_10 = arith.constant 0 : i32
    %41 = arith.addi %40, %c0_i32_10 : i32
    %42 = arith.index_cast %41 : i32 to index
    %43 = memref.load %arg4[%42] : memref<10xi32, #tpu.memory_space<smem>>
    %44 = vector.broadcast %39 : i32 to vector<1x48xi32>
    %45 = arith.cmpi sge, %1, %44 : vector<1x48xi32>
    %46 = arith.addi %39, %43 : i32
    %47 = vector.broadcast %46 : i32 to vector<1x48xi32>
    %48 = arith.cmpi slt, %1, %47 : vector<1x48xi32>
    %49 = arith.andi %45, %48 : vector<1x48xi1>
    %50 = arith.ori %5, %49 : vector<1x48xi1>
    %c2_i32_11 = arith.constant 2 : i32
    %51 = arith.muli %3, %c2_i32_11 : i32
    %c1_i32_12 = arith.constant 1 : i32
    %52 = arith.addi %51, %c1_i32_12 : i32
    %53 = arith.index_cast %52 : i32 to index
    %54 = memref.load %arg3[%53] : memref<10xi32, #tpu.memory_space<smem>>
    %c2_i32_13 = arith.constant 2 : i32
    %55 = arith.muli %3, %c2_i32_13 : i32
    %c1_i32_14 = arith.constant 1 : i32
    %56 = arith.addi %55, %c1_i32_14 : i32
    %57 = arith.index_cast %56 : i32 to index
    %58 = memref.load %arg4[%57] : memref<10xi32, #tpu.memory_space<smem>>
    %59 = vector.broadcast %54 : i32 to vector<1x48xi32>
    %60 = arith.cmpi sge, %1, %59 : vector<1x48xi32>
    %61 = arith.addi %54, %58 : i32
    %62 = vector.broadcast %61 : i32 to vector<1x48xi32>
    %63 = arith.cmpi slt, %1, %62 : vector<1x48xi32>
    %64 = arith.andi %60, %63 : vector<1x48xi1>
    %65 = arith.ori %50, %64 : vector<1x48xi1>
    %66 = vector.broadcast %35 : vector<16x1xi1> to vector<16x48xi1>
    %67 = vector.broadcast %65 : vector<1x48xi1> to vector<16x48xi1>
    %68 = arith.ori %66, %67 : vector<16x48xi1>
    %c0 = arith.constant 0 : index
    %c0_15 = arith.constant 0 : index
    %c0_16 = arith.constant 0 : index
    %69 = vector.load %arg5[%c0, %c0_15, %c0_16] : memref<5x16x48xf32, #tpu.memory_space<vmem>>, vector<1x16x48xf32>
    %70 = vector.shape_cast %69 : vector<1x16x48xf32> to vector<16x48xf32>
    %cst = arith.constant 0.000000e+00 : f32
    %71 = vector.broadcast %cst : f32 to vector<16x48xf32>
    %72 = arith.select %68, %71, %70 : vector<16x48xi1>, vector<16x48xf32>
    %c0_17 = arith.constant 0 : index
    %c0_18 = arith.constant 0 : index
    %c0_19 = arith.constant 0 : index
    %73 = vector.load %arg6[%c0_17, %c0_18, %c0_19] : memref<5x16x48xf32, #tpu.memory_space<vmem>>, vector<1x16x48xf32>
    %74 = vector.shape_cast %73 : vector<1x16x48xf32> to vector<16x48xf32>
    %75 = vector.shape_cast %72 : vector<16x48xf32> to vector<1x16x48xf32>
    tpu.vector_store %arg6[%c0_17, %c0_18, %c0_19], %75 {strides = array<i32>} : memref<5x16x48xf32, #tpu.memory_space<vmem>>, vector<1x16x48xf32>,
    %c5_i32_20 = arith.constant 5 : i32
    %76 = arith.muli %arg0, %c5_i32_20 : i32
    %c1_i32_21 = arith.constant 1 : i32
    %77 = arith.addi %76, %c1_i32_21 : i32
    %false_22 = arith.constant false
    %78 = vector.broadcast %false_22 : i1 to vector<16x1xi1>
    %false_23 = arith.constant false
    %79 = vector.broadcast %false_23 : i1 to vector<1x48xi1>
    %c2_i32_24 = arith.constant 2 : i32
    %80 = arith.muli %77, %c2_i32_24 : i32
    %c0_i32_25 = arith.constant 0 : i32
    %81 = arith.addi %80, %c0_i32_25 : i32
    %82 = arith.index_cast %81 : i32 to index
    %83 = memref.load %arg1[%82] : memref<10xi32, #tpu.memory_space<smem>>
    %c2_i32_26 = arith.constant 2 : i32
    %84 = arith.muli %77, %c2_i32_26 : i32
    %c0_i32_27 = arith.constant 0 : i32
    %85 = arith.addi %84, %c0_i32_27 : i32
    %86 = arith.index_cast %85 : i32 to index
    %87 = memref.load %arg2[%86] : memref<10xi32, #tpu.memory_space<smem>>
    %88 = vector.broadcast %83 : i32 to vector<16x1xi32>
    %89 = arith.cmpi sge, %0, %88 : vector<16x1xi32>
    %90 = arith.addi %83, %87 : i32
    %91 = vector.broadcast %90 : i32 to vector<16x1xi32>
    %92 = arith.cmpi slt, %0, %91 : vector<16x1xi32>
    %93 = arith.andi %89, %92 : vector<16x1xi1>
    %94 = arith.ori %78, %93 : vector<16x1xi1>
    %c2_i32_28 = arith.constant 2 : i32
    %95 = arith.muli %77, %c2_i32_28 : i32
    %c1_i32_29 = arith.constant 1 : i32
    %96 = arith.addi %95, %c1_i32_29 : i32
    %97 = arith.index_cast %96 : i32 to index
    %98 = memref.load %arg1[%97] : memref<10xi32, #tpu.memory_space<smem>>
    %c2_i32_30 = arith.constant 2 : i32
    %99 = arith.muli %77, %c2_i32_30 : i32
    %c1_i32_31 = arith.constant 1 : i32
    %100 = arith.addi %99, %c1_i32_31 : i32
    %101 = arith.index_cast %100 : i32 to index
    %102 = memref.load %arg2[%101] : memref<10xi32, #tpu.memory_space<smem>>
    %103 = vector.broadcast %98 : i32 to vector<16x1xi32>
    %104 = arith.cmpi sge, %0, %103 : vector<16x1xi32>
    %105 = arith.addi %98, %102 : i32
    %106 = vector.broadcast %105 : i32 to vector<16x1xi32>
    %107 = arith.cmpi slt, %0, %106 : vector<16x1xi32>
    %108 = arith.andi %104, %107 : vector<16x1xi1>
    %109 = arith.ori %94, %108 : vector<16x1xi1>
    %c2_i32_32 = arith.constant 2 : i32
    %110 = arith.muli %77, %c2_i32_32 : i32
    %c0_i32_33 = arith.constant 0 : i32
    %111 = arith.addi %110, %c0_i32_33 : i32
    %112 = arith.index_cast %111 : i32 to index
    %113 = memref.load %arg3[%112] : memref<10xi32, #tpu.memory_space<smem>>
    %c2_i32_34 = arith.constant 2 : i32
    %114 = arith.muli %77, %c2_i32_34 : i32
    %c0_i32_35 = arith.constant 0 : i32
    %115 = arith.addi %114, %c0_i32_35 : i32
    %116 = arith.index_cast %115 : i32 to index
    %117 = memref.load %arg4[%116] : memref<10xi32, #tpu.memory_space<smem>>
    %118 = vector.broadcast %113 : i32 to vector<1x48xi32>
    %119 = arith.cmpi sge, %1, %118 : vector<1x48xi32>
    %120 = arith.addi %113, %117 : i32
    %121 = vector.broadcast %120 : i32 to vector<1x48xi32>
    %122 = arith.cmpi slt, %1, %121 : vector<1x48xi32>
    %123 = arith.andi %119, %122 : vector<1x48xi1>
    %124 = arith.ori %79, %123 : vector<1x48xi1>
    %c2_i32_36 = arith.constant 2 : i32
    %125 = arith.muli %77, %c2_i32_36 : i32
    %c1_i32_37 = arith.constant 1 : i32
    %126 = arith.addi %125, %c1_i32_37 : i32
    %127 = arith.index_cast %126 : i32 to index
    %128 = memref.load %arg3[%127] : memref<10xi32, #tpu.memory_space<smem>>
    %c2_i32_38 = arith.constant 2 : i32
    %129 = arith.muli %77, %c2_i32_38 : i32
    %c1_i32_39 = arith.constant 1 : i32
    %130 = arith.addi %129, %c1_i32_39 : i32
    %131 = arith.index_cast %130 : i32 to index
    %132 = memref.load %arg4[%131] : memref<10xi32, #tpu.memory_space<smem>>
    %133 = vector.broadcast %128 : i32 to vector<1x48xi32>
    %134 = arith.cmpi sge, %1, %133 : vector<1x48xi32>
    %135 = arith.addi %128, %132 : i32
    %136 = vector.broadcast %135 : i32 to vector<1x48xi32>
    %137 = arith.cmpi slt, %1, %136 : vector<1x48xi32>
    %138 = arith.andi %134, %137 : vector<1x48xi1>
    %139 = arith.ori %124, %138 : vector<1x48xi1>
    %140 = vector.broadcast %109 : vector<16x1xi1> to vector<16x48xi1>
    %141 = vector.broadcast %139 : vector<1x48xi1> to vector<16x48xi1>
    %142 = arith.ori %140, %141 : vector<16x48xi1>
    %c1 = arith.constant 1 : index
    %c0_40 = arith.constant 0 : index
    %c0_41 = arith.constant 0 : index
    %143 = vector.load %arg5[%c1, %c0_40, %c0_41] : memref<5x16x48xf32, #tpu.memory_space<vmem>>, vector<1x16x48xf32>
    %144 = vector.shape_cast %143 : vector<1x16x48xf32> to vector<16x48xf32>
    %cst_42 = arith.constant 0.000000e+00 : f32
    %145 = vector.broadcast %cst_42 : f32 to vector<16x48xf32>
    %146 = arith.select %142, %145, %144 : vector<16x48xi1>, vector<16x48xf32>
    %c1_43 = arith.constant 1 : index
    %c0_44 = arith.constant 0 : index
    %c0_45 = arith.constant 0 : index
    %147 = vector.load %arg6[%c1_43, %c0_44, %c0_45] : memref<5x16x48xf32, #tpu.memory_space<vmem>>, vector<1x16x48xf32>
    %148 = vector.shape_cast %147 : vector<1x16x48xf32> to vector<16x48xf32>
    %149 = vector.shape_cast %146 : vector<16x48xf32> to vector<1x16x48xf32>
    tpu.vector_store %arg6[%c1_43, %c0_44, %c0_45], %149 {strides = array<i32>} : memref<5x16x48xf32, #tpu.memory_space<vmem>>, vector<1x16x48xf32>,
    %c5_i32_46 = arith.constant 5 : i32
    %150 = arith.muli %arg0, %c5_i32_46 : i32
    %c2_i32_47 = arith.constant 2 : i32
    %151 = arith.addi %150, %c2_i32_47 : i32
    %false_48 = arith.constant false
    %152 = vector.broadcast %false_48 : i1 to vector<16x1xi1>
    %false_49 = arith.constant false
    %153 = vector.broadcast %false_49 : i1 to vector<1x48xi1>
    %c2_i32_50 = arith.constant 2 : i32
    %154 = arith.muli %151, %c2_i32_50 : i32
    %c0_i32_51 = arith.constant 0 : i32
    %155 = arith.addi %154, %c0_i32_51 : i32
    %156 = arith.index_cast %155 : i32 to index
    %157 = memref.load %arg1[%156] : memref<10xi32, #tpu.memory_space<smem>>
    %c2_i32_52 = arith.constant 2 : i32
    %158 = arith.muli %151, %c2_i32_52 : i32
    %c0_i32_53 = arith.constant 0 : i32
    %159 = arith.addi %158, %c0_i32_53 : i32
    %160 = arith.index_cast %159 : i32 to index
    %161 = memref.load %arg2[%160] : memref<10xi32, #tpu.memory_space<smem>>
    %162 = vector.broadcast %157 : i32 to vector<16x1xi32>
    %163 = arith.cmpi sge, %0, %162 : vector<16x1xi32>
    %164 = arith.addi %157, %161 : i32
    %165 = vector.broadcast %164 : i32 to vector<16x1xi32>
    %166 = arith.cmpi slt, %0, %165 : vector<16x1xi32>
    %167 = arith.andi %163, %166 : vector<16x1xi1>
    %168 = arith.ori %152, %167 : vector<16x1xi1>
    %c2_i32_54 = arith.constant 2 : i32
    %169 = arith.muli %151, %c2_i32_54 : i32
    %c1_i32_55 = arith.constant 1 : i32
    %170 = arith.addi %169, %c1_i32_55 : i32
    %171 = arith.index_cast %170 : i32 to index
    %172 = memref.load %arg1[%171] : memref<10xi32, #tpu.memory_space<smem>>
    %c2_i32_56 = arith.constant 2 : i32
    %173 = arith.muli %151, %c2_i32_56 : i32
    %c1_i32_57 = arith.constant 1 : i32
    %174 = arith.addi %173, %c1_i32_57 : i32
    %175 = arith.index_cast %174 : i32 to index
    %176 = memref.load %arg2[%175] : memref<10xi32, #tpu.memory_space<smem>>
    %177 = vector.broadcast %172 : i32 to vector<16x1xi32>
    %178 = arith.cmpi sge, %0, %177 : vector<16x1xi32>
    %179 = arith.addi %172, %176 : i32
    %180 = vector.broadcast %179 : i32 to vector<16x1xi32>
    %181 = arith.cmpi slt, %0, %180 : vector<16x1xi32>
    %182 = arith.andi %178, %181 : vector<16x1xi1>
    %183 = arith.ori %168, %182 : vector<16x1xi1>
    %c2_i32_58 = arith.constant 2 : i32
    %184 = arith.muli %151, %c2_i32_58 : i32
    %c0_i32_59 = arith.constant 0 : i32
    %185 = arith.addi %184, %c0_i32_59 : i32
    %186 = arith.index_cast %185 : i32 to index
    %187 = memref.load %arg3[%186] : memref<10xi32, #tpu.memory_space<smem>>
    %c2_i32_60 = arith.constant 2 : i32
    %188 = arith.muli %151, %c2_i32_60 : i32
    %c0_i32_61 = arith.constant 0 : i32
    %189 = arith.addi %188, %c0_i32_61 : i32
    %190 = arith.index_cast %189 : i32 to index
    %191 = memref.load %arg4[%190] : memref<10xi32, #tpu.memory_space<smem>>
    %192 = vector.broadcast %187 : i32 to vector<1x48xi32>
    %193 = arith.cmpi sge, %1, %192 : vector<1x48xi32>
    %194 = arith.addi %187, %191 : i32
    %195 = vector.broadcast %194 : i32 to vector<1x48xi32>
    %196 = arith.cmpi slt, %1, %195 : vector<1x48xi32>
    %197 = arith.andi %193, %196 : vector<1x48xi1>
    %198 = arith.ori %153, %197 : vector<1x48xi1>
    %c2_i32_62 = arith.constant 2 : i32
    %199 = arith.muli %151, %c2_i32_62 : i32
    %c1_i32_63 = arith.constant 1 : i32
    %200 = arith.addi %199, %c1_i32_63 : i32
    %201 = arith.index_cast %200 : i32 to index
    %202 = memref.load %arg3[%201] : memref<10xi32, #tpu.memory_space<smem>>
    %c2_i32_64 = arith.constant 2 : i32
    %203 = arith.muli %151, %c2_i32_64 : i32
    %c1_i32_65 = arith.constant 1 : i32
    %204 = arith.addi %203, %c1_i32_65 : i32
    %205 = arith.index_cast %204 : i32 to index
    %206 = memref.load %arg4[%205] : memref<10xi32, #tpu.memory_space<smem>>
    %207 = vector.broadcast %202 : i32 to vector<1x48xi32>
    %208 = arith.cmpi sge, %1, %207 : vector<1x48xi32>
    %209 = arith.addi %202, %206 : i32
    %210 = vector.broadcast %209 : i32 to vector<1x48xi32>
    %211 = arith.cmpi slt, %1, %210 : vector<1x48xi32>
    %212 = arith.andi %208, %211 : vector<1x48xi1>
    %213 = arith.ori %198, %212 : vector<1x48xi1>
    %214 = vector.broadcast %183 : vector<16x1xi1> to vector<16x48xi1>
    %215 = vector.broadcast %213 : vector<1x48xi1> to vector<16x48xi1>
    %216 = arith.ori %214, %215 : vector<16x48xi1>
    %c2 = arith.constant 2 : index
    %c0_66 = arith.constant 0 : index
    %c0_67 = arith.constant 0 : index
    %217 = vector.load %arg5[%c2, %c0_66, %c0_67] : memref<5x16x48xf32, #tpu.memory_space<vmem>>, vector<1x16x48xf32>
    %218 = vector.shape_cast %217 : vector<1x16x48xf32> to vector<16x48xf32>
    %cst_68 = arith.constant 0.000000e+00 : f32
    %219 = vector.broadcast %cst_68 : f32 to vector<16x48xf32>
    %220 = arith.select %216, %219, %218 : vector<16x48xi1>, vector<16x48xf32>
    %c2_69 = arith.constant 2 : index
    %c0_70 = arith.constant 0 : index
    %c0_71 = arith.constant 0 : index
    %221 = vector.load %arg6[%c2_69, %c0_70, %c0_71] : memref<5x16x48xf32, #tpu.memory_space<vmem>>, vector<1x16x48xf32>
    %222 = vector.shape_cast %221 : vector<1x16x48xf32> to vector<16x48xf32>
    %223 = vector.shape_cast %220 : vector<16x48xf32> to vector<1x16x48xf32>
    tpu.vector_store %arg6[%c2_69, %c0_70, %c0_71], %223 {strides = array<i32>} : memref<5x16x48xf32, #tpu.memory_space<vmem>>, vector<1x16x48xf32>,
    %c5_i32_72 = arith.constant 5 : i32
    %224 = arith.muli %arg0, %c5_i32_72 : i32
    %c3_i32 = arith.constant 3 : i32
    %225 = arith.addi %224, %c3_i32 : i32
    %false_73 = arith.constant false
    %226 = vector.broadcast %false_73 : i1 to vector<16x1xi1>
    %false_74 = arith.constant false
    %227 = vector.broadcast %false_74 : i1 to vector<1x48xi1>
    %c2_i32_75 = arith.constant 2 : i32
    %228 = arith.muli %225, %c2_i32_75 : i32
    %c0_i32_76 = arith.constant 0 : i32
    %229 = arith.addi %228, %c0_i32_76 : i32
    %230 = arith.index_cast %229 : i32 to index
    %231 = memref.load %arg1[%230] : memref<10xi32, #tpu.memory_space<smem>>
    %c2_i32_77 = arith.constant 2 : i32
    %232 = arith.muli %225, %c2_i32_77 : i32
    %c0_i32_78 = arith.constant 0 : i32
    %233 = arith.addi %232, %c0_i32_78 : i32
    %234 = arith.index_cast %233 : i32 to index
    %235 = memref.load %arg2[%234] : memref<10xi32, #tpu.memory_space<smem>>
    %236 = vector.broadcast %231 : i32 to vector<16x1xi32>
    %237 = arith.cmpi sge, %0, %236 : vector<16x1xi32>
    %238 = arith.addi %231, %235 : i32
    %239 = vector.broadcast %238 : i32 to vector<16x1xi32>
    %240 = arith.cmpi slt, %0, %239 : vector<16x1xi32>
    %241 = arith.andi %237, %240 : vector<16x1xi1>
    %242 = arith.ori %226, %241 : vector<16x1xi1>
    %c2_i32_79 = arith.constant 2 : i32
    %243 = arith.muli %225, %c2_i32_79 : i32
    %c1_i32_80 = arith.constant 1 : i32
    %244 = arith.addi %243, %c1_i32_80 : i32
    %245 = arith.index_cast %244 : i32 to index
    %246 = memref.load %arg1[%245] : memref<10xi32, #tpu.memory_space<smem>>
    %c2_i32_81 = arith.constant 2 : i32
    %247 = arith.muli %225, %c2_i32_81 : i32
    %c1_i32_82 = arith.constant 1 : i32
    %248 = arith.addi %247, %c1_i32_82 : i32
    %249 = arith.index_cast %248 : i32 to index
    %250 = memref.load %arg2[%249] : memref<10xi32, #tpu.memory_space<smem>>
    %251 = vector.broadcast %246 : i32 to vector<16x1xi32>
    %252 = arith.cmpi sge, %0, %251 : vector<16x1xi32>
    %253 = arith.addi %246, %250 : i32
    %254 = vector.broadcast %253 : i32 to vector<16x1xi32>
    %255 = arith.cmpi slt, %0, %254 : vector<16x1xi32>
    %256 = arith.andi %252, %255 : vector<16x1xi1>
    %257 = arith.ori %242, %256 : vector<16x1xi1>
    %c2_i32_83 = arith.constant 2 : i32
    %258 = arith.muli %225, %c2_i32_83 : i32
    %c0_i32_84 = arith.constant 0 : i32
    %259 = arith.addi %258, %c0_i32_84 : i32
    %260 = arith.index_cast %259 : i32 to index
    %261 = memref.load %arg3[%260] : memref<10xi32, #tpu.memory_space<smem>>
    %c2_i32_85 = arith.constant 2 : i32
    %262 = arith.muli %225, %c2_i32_85 : i32
    %c0_i32_86 = arith.constant 0 : i32
    %263 = arith.addi %262, %c0_i32_86 : i32
    %264 = arith.index_cast %263 : i32 to index
    %265 = memref.load %arg4[%264] : memref<10xi32, #tpu.memory_space<smem>>
    %266 = vector.broadcast %261 : i32 to vector<1x48xi32>
    %267 = arith.cmpi sge, %1, %266 : vector<1x48xi32>
    %268 = arith.addi %261, %265 : i32
    %269 = vector.broadcast %268 : i32 to vector<1x48xi32>
    %270 = arith.cmpi slt, %1, %269 : vector<1x48xi32>
    %271 = arith.andi %267, %270 : vector<1x48xi1>
    %272 = arith.ori %227, %271 : vector<1x48xi1>
    %c2_i32_87 = arith.constant 2 : i32
    %273 = arith.muli %225, %c2_i32_87 : i32
    %c1_i32_88 = arith.constant 1 : i32
    %274 = arith.addi %273, %c1_i32_88 : i32
    %275 = arith.index_cast %274 : i32 to index
    %276 = memref.load %arg3[%275] : memref<10xi32, #tpu.memory_space<smem>>
    %c2_i32_89 = arith.constant 2 : i32
    %277 = arith.muli %225, %c2_i32_89 : i32
    %c1_i32_90 = arith.constant 1 : i32
    %278 = arith.addi %277, %c1_i32_90 : i32
    %279 = arith.index_cast %278 : i32 to index
    %280 = memref.load %arg4[%279] : memref<10xi32, #tpu.memory_space<smem>>
    %281 = vector.broadcast %276 : i32 to vector<1x48xi32>
    %282 = arith.cmpi sge, %1, %281 : vector<1x48xi32>
    %283 = arith.addi %276, %280 : i32
    %284 = vector.broadcast %283 : i32 to vector<1x48xi32>
    %285 = arith.cmpi slt, %1, %284 : vector<1x48xi32>
    %286 = arith.andi %282, %285 : vector<1x48xi1>
    %287 = arith.ori %272, %286 : vector<1x48xi1>
    %288 = vector.broadcast %257 : vector<16x1xi1> to vector<16x48xi1>
    %289 = vector.broadcast %287 : vector<1x48xi1> to vector<16x48xi1>
    %290 = arith.ori %288, %289 : vector<16x48xi1>
    %c3 = arith.constant 3 : index
    %c0_91 = arith.constant 0 : index
    %c0_92 = arith.constant 0 : index
    %291 = vector.load %arg5[%c3, %c0_91, %c0_92] : memref<5x16x48xf32, #tpu.memory_space<vmem>>, vector<1x16x48xf32>
    %292 = vector.shape_cast %291 : vector<1x16x48xf32> to vector<16x48xf32>
    %cst_93 = arith.constant 0.000000e+00 : f32
    %293 = vector.broadcast %cst_93 : f32 to vector<16x48xf32>
    %294 = arith.select %290, %293, %292 : vector<16x48xi1>, vector<16x48xf32>
    %c3_94 = arith.constant 3 : index
    %c0_95 = arith.constant 0 : index
    %c0_96 = arith.constant 0 : index
    %295 = vector.load %arg6[%c3_94, %c0_95, %c0_96] : memref<5x16x48xf32, #tpu.memory_space<vmem>>, vector<1x16x48xf32>
    %296 = vector.shape_cast %295 : vector<1x16x48xf32> to vector<16x48xf32>
    %297 = vector.shape_cast %294 : vector<16x48xf32> to vector<1x16x48xf32>
    tpu.vector_store %arg6[%c3_94, %c0_95, %c0_96], %297 {strides = array<i32>} : memref<5x16x48xf32, #tpu.memory_space<vmem>>, vector<1x16x48xf32>,
    %c5_i32_97 = arith.constant 5 : i32
    %298 = arith.muli %arg0, %c5_i32_97 : i32
    %c4_i32 = arith.constant 4 : i32
    %299 = arith.addi %298, %c4_i32 : i32
    %false_98 = arith.constant false
    %300 = vector.broadcast %false_98 : i1 to vector<16x1xi1>
    %false_99 = arith.constant false
    %301 = vector.broadcast %false_99 : i1 to vector<1x48xi1>
    %c2_i32_100 = arith.constant 2 : i32
    %302 = arith.muli %299, %c2_i32_100 : i32
    %c0_i32_101 = arith.constant 0 : i32
    %303 = arith.addi %302, %c0_i32_101 : i32
    %304 = arith.index_cast %303 : i32 to index
    %305 = memref.load %arg1[%304] : memref<10xi32, #tpu.memory_space<smem>>
    %c2_i32_102 = arith.constant 2 : i32
    %306 = arith.muli %299, %c2_i32_102 : i32
    %c0_i32_103 = arith.constant 0 : i32
    %307 = arith.addi %306, %c0_i32_103 : i32
    %308 = arith.index_cast %307 : i32 to index
    %309 = memref.load %arg2[%308] : memref<10xi32, #tpu.memory_space<smem>>
    %310 = vector.broadcast %305 : i32 to vector<16x1xi32>
    %311 = arith.cmpi sge, %0, %310 : vector<16x1xi32>
    %312 = arith.addi %305, %309 : i32
    %313 = vector.broadcast %312 : i32 to vector<16x1xi32>
    %314 = arith.cmpi slt, %0, %313 : vector<16x1xi32>
    %315 = arith.andi %311, %314 : vector<16x1xi1>
    %316 = arith.ori %300, %315 : vector<16x1xi1>
    %c2_i32_104 = arith.constant 2 : i32
    %317 = arith.muli %299, %c2_i32_104 : i32
    %c1_i32_105 = arith.constant 1 : i32
    %318 = arith.addi %317, %c1_i32_105 : i32
    %319 = arith.index_cast %318 : i32 to index
    %320 = memref.load %arg1[%319] : memref<10xi32, #tpu.memory_space<smem>>
    %c2_i32_106 = arith.constant 2 : i32
    %321 = arith.muli %299, %c2_i32_106 : i32
    %c1_i32_107 = arith.constant 1 : i32
    %322 = arith.addi %321, %c1_i32_107 : i32
    %323 = arith.index_cast %322 : i32 to index
    %324 = memref.load %arg2[%323] : memref<10xi32, #tpu.memory_space<smem>>
    %325 = vector.broadcast %320 : i32 to vector<16x1xi32>
    %326 = arith.cmpi sge, %0, %325 : vector<16x1xi32>
    %327 = arith.addi %320, %324 : i32
    %328 = vector.broadcast %327 : i32 to vector<16x1xi32>
    %329 = arith.cmpi slt, %0, %328 : vector<16x1xi32>
    %330 = arith.andi %326, %329 : vector<16x1xi1>
    %331 = arith.ori %316, %330 : vector<16x1xi1>
    %c2_i32_108 = arith.constant 2 : i32
    %332 = arith.muli %299, %c2_i32_108 : i32
    %c0_i32_109 = arith.constant 0 : i32
    %333 = arith.addi %332, %c0_i32_109 : i32
    %334 = arith.index_cast %333 : i32 to index
    %335 = memref.load %arg3[%334] : memref<10xi32, #tpu.memory_space<smem>>
    %c2_i32_110 = arith.constant 2 : i32
    %336 = arith.muli %299, %c2_i32_110 : i32
    %c0_i32_111 = arith.constant 0 : i32
    %337 = arith.addi %336, %c0_i32_111 : i32
    %338 = arith.index_cast %337 : i32 to index
    %339 = memref.load %arg4[%338] : memref<10xi32, #tpu.memory_space<smem>>
    %340 = vector.broadcast %335 : i32 to vector<1x48xi32>
    %341 = arith.cmpi sge, %1, %340 : vector<1x48xi32>
    %342 = arith.addi %335, %339 : i32
    %343 = vector.broadcast %342 : i32 to vector<1x48xi32>
    %344 = arith.cmpi slt, %1, %343 : vector<1x48xi32>
    %345 = arith.andi %341, %344 : vector<1x48xi1>
    %346 = arith.ori %301, %345 : vector<1x48xi1>
    %c2_i32_112 = arith.constant 2 : i32
    %347 = arith.muli %299, %c2_i32_112 : i32
    %c1_i32_113 = arith.constant 1 : i32
    %348 = arith.addi %347, %c1_i32_113 : i32
    %349 = arith.index_cast %348 : i32 to index
    %350 = memref.load %arg3[%349] : memref<10xi32, #tpu.memory_space<smem>>
    %c2_i32_114 = arith.constant 2 : i32
    %351 = arith.muli %299, %c2_i32_114 : i32
    %c1_i32_115 = arith.constant 1 : i32
    %352 = arith.addi %351, %c1_i32_115 : i32
    %353 = arith.index_cast %352 : i32 to index
    %354 = memref.load %arg4[%353] : memref<10xi32, #tpu.memory_space<smem>>
    %355 = vector.broadcast %350 : i32 to vector<1x48xi32>
    %356 = arith.cmpi sge, %1, %355 : vector<1x48xi32>
    %357 = arith.addi %350, %354 : i32
    %358 = vector.broadcast %357 : i32 to vector<1x48xi32>
    %359 = arith.cmpi slt, %1, %358 : vector<1x48xi32>
    %360 = arith.andi %356, %359 : vector<1x48xi1>
    %361 = arith.ori %346, %360 : vector<1x48xi1>
    %362 = vector.broadcast %331 : vector<16x1xi1> to vector<16x48xi1>
    %363 = vector.broadcast %361 : vector<1x48xi1> to vector<16x48xi1>
    %364 = arith.ori %362, %363 : vector<16x48xi1>
    %c4 = arith.constant 4 : index
    %c0_116 = arith.constant 0 : index
    %c0_117 = arith.constant 0 : index
    %365 = vector.load %arg5[%c4, %c0_116, %c0_117] : memref<5x16x48xf32, #tpu.memory_space<vmem>>, vector<1x16x48xf32>
    %366 = vector.shape_cast %365 : vector<1x16x48xf32> to vector<16x48xf32>
    %cst_118 = arith.constant 0.000000e+00 : f32
    %367 = vector.broadcast %cst_118 : f32 to vector<16x48xf32>
    %368 = arith.select %364, %367, %366 : vector<16x48xi1>, vector<16x48xf32>
    %c4_119 = arith.constant 4 : index
    %c0_120 = arith.constant 0 : index
    %c0_121 = arith.constant 0 : index
    %369 = vector.load %arg6[%c4_119, %c0_120, %c0_121] : memref<5x16x48xf32, #tpu.memory_space<vmem>>, vector<1x16x48xf32>
    %370 = vector.shape_cast %369 : vector<1x16x48xf32> to vector<16x48xf32>
    %371 = vector.shape_cast %368 : vector<16x48xf32> to vector<1x16x48xf32>
    tpu.vector_store %arg6[%c4_119, %c0_120, %c0_121], %371 {strides = array<i32>} : memref<5x16x48xf32, #tpu.memory_space<vmem>>, vector<1x16x48xf32>,
    return
  }
  func.func @transform_0(%arg0: i32, %arg1: memref<10xi32, #tpu.memory_space<smem>>, %arg2: memref<10xi32, #tpu.memory_space<smem>>, %arg3: memref<10xi32, #tpu.memory_space<smem>>, %arg4: memref<10xi32, #tpu.memory_space<smem>>) -> (i32, i32, i32) {
    %c0_i32 = arith.constant 0 : i32
    %c0_i32_0 = arith.constant 0 : i32
    %c0_i32_1 = arith.constant 0 : i32
    return %arg0, %c0_i32, %c0_i32_0 : i32, i32, i32
  }
  func.func @transform_1(%arg0: i32, %arg1: memref<10xi32, #tpu.memory_space<smem>>, %arg2: memref<10xi32, #tpu.memory_space<smem>>, %arg3: memref<10xi32, #tpu.memory_space<smem>>, %arg4: memref<10xi32, #tpu.memory_space<smem>>) -> (i32, i32, i32) {
    %c0_i32 = arith.constant 0 : i32
    %c0_i32_0 = arith.constant 0 : i32
    %c0_i32_1 = arith.constant 0 : i32
    return %arg0, %c0_i32, %c0_i32_0 : i32, i32, i32
  }
}

</mosaic_0001>

<bundles_post_ra>
// kernel: tpu_custom_call.1
= control target key start
LH: loop header
LB: loop body
LE: loop exit
PB: predicated region body
PF: predicated region fallthrough
CT: control target
= control target key end

     0   :  { %s1044_s0 = inlined_call_operand.hbm [shape: s32[10], index: 0, kind: input, shape index: {}]   ;;  %s1045_s4 = inlined_call_operand.hbm [shape: f32[5,16,48], index: 4, kind: input, shape index: {}]   ;;  %s1046_s5 = inlined_call_operand.hbm [shape: f32[5,16,48], index: 5, kind: output, shape index: {}]   ;;  %s1047_s1 = inlined_call_operand.vmem [shape: s32[10], index: 1, kind: input, shape index: {}]   ;;  %s1048_s2 = inlined_call_operand.vmem [shape: s32[10], index: 2, kind: input, shape index: {}]   ;;  %s1049_s3 = inlined_call_operand.vmem [shape: s32[10], index: 3, kind: input, shape index: {}]  }
   0x1   :  { %s408_s20 = scalar_lea.hbm %s1044_s0, 16 }
   0x2   :  { %p409_p0 = scmp.ne.s32.totalorder %s1044_s0, %s408_s20  ;;  %p412_p1 = scmp.lt.u32.totalorder %s408_s20, %s1044_s0 }
   0x4   :  { %p414_p2 = pnand %p412_p1, %p409_p0 }
   0x6   :  { %417 = shalt.err (!%p414_p2)  }
   0x7   :  { %s504_s25 = smov [#allocation3]   ;;  %s12_s30 = sshll.u32 %s1047_s1, 4  ;;  %s13_s30 = int_to_ptr.vmem [resolvable:$true] %s12_s30 }
   0x8   :  { %11 = dma.hbm_to_smem %s1044_s0, 16, %s504_s25, [#allocation2] }
   0x9   :  { %s16_s8 = sshll.u32 %s1048_s2, 4  ;;  %s418_s9 = scalar_lea.vmem %s13_s30, 16  ;;  %s17_s8 = int_to_ptr.vmem [resolvable:$true] %s16_s8 }
   0xa   :  { %p419_p3 = scmp.ne.s32.totalorder %s13_s30, %s418_s9  ;;  %p423_p4 = scmp.lt.s32.totalorder %s13_s30, %s13_s30 }
   0xb   :  { %p424_p5 = scmp.lt.s32.totalorder %s418_s9, %s418_s9 }
   0xd   :  { %p425_p6 = por %p424_p5, %p423_p4 }
   0xf   :  { %p426_p7 = pnand %p425_p6, %p419_p3 }
  0x11   :  { %429 = shalt.err (!%p426_p7)  }
  0x12   :  { %s505_s10 = smov [#allocation4]   ;;  %s20_s12 = sshll.u32 %s1049_s3, 4  ;;  %s21_s12 = int_to_ptr.vmem [resolvable:$true] %s20_s12 }
  0x13   :  { %15 = dma.vmem_to_smem %s13_s30, 16, %s505_s10, [#allocation2] }
  0x14   :  { %s430_s1 = scalar_lea.vmem %s17_s8, 16  ;;  %p435_p9 = scmp.lt.s32.totalorder %s17_s8, %s17_s8 }
  0x15   :  { %p431_p8 = scmp.ne.s32.totalorder %s17_s8, %s430_s1  ;;  %p436_p10 = scmp.lt.s32.totalorder %s430_s1, %s430_s1 }
  0x17   :  { %p437_p11 = por %p436_p10, %p435_p9 }
  0x19   :  { %p438_p12 = pnand %p437_p11, %p431_p8 }
  0x1b   :  { %441 = shalt.err (!%p438_p12)  }
  0x1c   :  { %s506_s2 = smov [#allocation5]   ;;  %s442_s13 = scalar_lea.vmem %s21_s12, 16 }
  0x1d   :  { %19 = dma.vmem_to_smem %s17_s8, 16, %s506_s2, [#allocation2] }
  0x1e   :  { %p443_p13 = scmp.ne.s32.totalorder %s21_s12, %s442_s13  ;;  %p447_p0 = scmp.lt.s32.totalorder %s21_s12, %s21_s12 }
  0x1f   :  { %p448_p1 = scmp.lt.s32.totalorder %s442_s13, %s442_s13 }
  0x21   :  { %p449_p2 = por %p448_p1, %p447_p0 }
  0x23   :  { %p450_p3 = pnand %p449_p2, %p443_p13 }
  0x25   :  { %453 = shalt.err (!%p450_p3)  }
  0x26   :  { %s507_s14 = smov [#allocation6]  }
  0x27   :  { %23 = dma.vmem_to_smem %s21_s12, 16, %s507_s14, [#allocation2] }
  0x28   :  { %498 = dma.done.wait [#allocation2], 64 }
  0x29   :  { %499 = vsyncadd [#allocation2], 4294967232 }
  0x2a   :  { %25 = sfence }
  0x2b   :  { %26 = vsyncpa [#allocation8], 0 }
  0x2c   :  { %27 = vsyncpa [#allocation9], 0  ;;  %s508_s3 = smov [#allocation7]   ;;  %s454_s18 = scalar_lea.hbm %s1045_s4, 1280 }
  0x2d   :  { %s33_s15 = sshll.u32 %s508_s3, 4  ;;  %p455_p4 = scmp.ne.s32.totalorder %s1045_s4, %s454_s18  ;;  %s34_s15 = int_to_ptr.vmem [resolvable:$true] %s33_s15 }
  0x2e   :  { %p458_p5 = scmp.lt.u32.totalorder %s454_s18, %s1045_s4 }
  0x30   :  { %p460_p6 = pnand %p458_p5, %p455_p4 }
  0x32   :  { %463 = shalt.err (!%p460_p6)
}
  0x33   :  { %s464_s23 = scalar_lea.vmem %s34_s15, 1280  ;;  %p469_p8 = scmp.lt.s32.totalorder %s34_s15, %s34_s15 }
  0x34   :  { %p465_p7 = scmp.ne.s32.totalorder %s34_s15, %s464_s23  ;;  %p470_p9 = scmp.lt.s32.totalorder %s464_s23, %s464_s23 }
  0x36   :  { %p471_p10 = por %p470_p9, %p469_p8 }
  0x38   :  { %p472_p11 = pnand %p471_p10, %p465_p7 }
  0x3a   :  { %475 = shalt.err (!%p472_p11)
}
  0x3b   :  { %s509_s24 = smov 128   ;;  %s510_s25 = smov 8  }
  0x3c   :  { %39 = dma.hbm_to_vmem [thread:$0]  %s1045_s4, 1280, %s34_s15, [#allocation8], %s509_s24, %s509_s24, %s510_s25  }
  0x3d   :  { %500 = dma.done.wait [#allocation8], 1280  }
  0x3e   :  { %501 = vsyncadd [#allocation8], 4294966016  ;;  %v43_v0 = vlaneseq  ;;  %s578_s28 = sld [smem:[#allocation3]]  ;;  %s580_s30 = sld [smem:[#allocation3 + $0x1]]  ;;  %v99_v16 = vld [vmem:[#allocation7] sm:$0xff]  ;;  %vm103_vm13 = vcmask 392192  }
  0x3f   :  { %s50_s29 = sld [smem:[#allocation4]]  ;;  %s365_s6 = sld [smem:[#allocation4 + $0x1]]  ;;  %v100_v25 = vld [vmem:[#allocation7 + $0x8] sm:$0xff]  ;;  %v160_v36 = vld [vmem:[#allocation7 + $0x10] sm:$0xff]  ;;  %v161_v45 = vld [vmem:[#allocation7 + $0x18] sm:$0xff] }
  0x40   :  { %s74_s7 = sld [smem:[#allocation5]]  ;;  %v582_v1 = vshrl.u32 %v43_v0, 7  ;;  %s584_s9 = sld [smem:[#allocation5 + $0x1]]  ;;  %v592_v2 = vand.u32 127, %v43_v0  ;;  %v220_v56 = vld [vmem:[#allocation7 + $0x20] sm:$0xff]  ;;  %v280_v15 = vld [vmem:[#allocation7 + $0x30] sm:$0xff] }
  0x41   :  { %s75_s8 = sld [smem:[#allocation6]]  ;;  %s586_s4 = sld [smem:[#allocation6 + $0x1]] }
  0x42   :  { %s588_s10 = sld [smem:[#allocation3 + $0x2]]  ;;  %s594_s11 = sld [smem:[#allocation3 + $0x3]]  ;;  %v606_v6 = vadd.s32 8, %v582_v1 }
  0x43   :  { %s590_s0 = sld [smem:[#allocation4 + $0x2]]  ;;  %s596_s12 = sld [smem:[#allocation4 + $0x3]] }
  0x44   :  { %v51_v3 = vstv %s578_s28  ;;  %s600_s2 = sld [smem:[#allocation5 + $0x2]]  ;;  %v63_v5 = vstv %s580_s30  ;;  %s612_s15 = sld [smem:[#allocation5 + $0x3]] }
  0x45   :  { %s54_s1 = sadd.s32 %s50_s29, %s578_s28  ;;  %vm52_vm0 = vcmp.ge.s32.totalorder %v582_v1, %v51_v3  ;;  %s66_s13 = sadd.s32 %s365_s6, %s580_s30  ;;  %vm64_vm2 = vcmp.ge.s32.totalorder %v582_v1, %v63_v5  ;;  %vm649_vm14 = vcmp.ge.s32.totalorder %v606_v6, %v51_v3  ;;  %v221_v3 = vld [vmem:[#allocation7 + $0x28] sm:$0xff] }
  0x46   :  { %v55_v4 = vstv %s54_s1  ;;  %s608_s14 = sld [smem:[#allocation6 + $0x2]]  ;;  %v67_v7 = vstv %s66_s13  ;;  %v76_v8 = vstv %s74_s7  ;;  %v84_v11 = vstv %s584_s9  ;;  %s623_s17 = sld [smem:[#allocation6 + $0x3]] }
  0x47   :  { %vm56_vm1 = vcmp.lt.s32.totalorder %v582_v1, %v55_v4  ;;  %s78_s3 = sadd.s32 %s75_s8, %s74_s7  ;;  %vm68_vm4 = vcmp.lt.s32.totalorder %v582_v1, %v67_v7  ;;  %vm77_vm5 = vcmp.ge.s32.totalorder %v592_v2, %v76_v8  ;;  %s86_s16 = sadd.s32 %s586_s4, %s584_s9  ;;  %vm85_vm8 = vcmp.ge.s32.totalorder %v592_v2, %v84_v11 }
  0x48   :  { %vm614_vm3 = vmand %vm52_vm0, %vm56_vm1  ;;  %v79_v10 = vstv %s78_s3  ;;  %v87_v13 = vstv %s86_s16  ;;  %vm57_vm15 = vcmp.lt.s32.totalorder %v606_v6, %v55_v4  ;;  %s654_s20 = sld [smem:[#allocation3 + $0x4]]  ;;  %vm65_vm1 = vcmp.ge.s32.totalorder %v606_v6, %v63_v5  ;;  %s667_s23 = sld [smem:[#allocation3 + $0x5]] }
  0x49   :  { %vm625_vm6 = vmand %vm64_vm2, %vm68_vm4  ;;  %vm80_vm7 = vcmp.lt.s32.totalorder %v592_v2, %v79_v10  ;;  %vm88_vm10 = vcmp.lt.s32.totalorder %v592_v2, %v87_v13  ;;  %s114_s18 = sadd.s32 %s590_s0, %s588_s10  ;;  %s126_s19 = sadd.s32 %s596_s12, %s594_s11  ;;  %vm69_vm2 = vcmp.lt.s32.totalorder %v606_v6, %v67_v7  ;;  %v111_v18 = vstv %s588_s10 }
  0x4a   :  { %vm72_vm9 = vmor %vm614_vm3, %vm625_vm6  ;;  %s656_s21 = sld [smem:[#allocation4 + $0x4]]  ;;  %v115_v19 = vstv %s114_s18  ;;  %v123_v20 = vstv %s594_s11  ;;  %v127_v21 = vstv %s126_s19  ;;  %s682_s27 = sld [smem:[#allocation4 + $0x5]]  ;;  %vm698_vm3 = vcmp.ge.s32.totalorder %v582_v1, %v111_v18 }
  0x4b   :  { %vm638_vm11 = vmand %vm77_vm5, %vm80_vm7  ;;  %vm116_vm6 = vcmp.lt.s32.totalorder %v582_v1, %v115_v19  ;;  %v136_v27 = vstv %s600_s2  ;;  %s704_s28 = sld [smem:[#allocation5 + $0x4]]  ;;  %v144_v29 = vstv %s612_s15  ;;  %s715_s30 = sld [smem:[#allocation5 + $0x5]] }
  0x4c   :  { %vm644_vm12 = vmand %vm85_vm8, %vm88_vm10  ;;  %s138_s22 = sadd.s32 %s608_s14, %s600_s2  ;;  %s146_s26 = sadd.s32 %s623_s17, %s612_s15  ;;  %vm128_vm10 = vcmp.lt.s32.totalorder %v582_v1, %v127_v21 }
  0x4d   :  { %vm90_vm0 = vmor %vm638_vm11, %vm644_vm12  ;;  %v139_v28 = vstv %s138_s22  ;;  %s706_s29 = sld [smem:[#allocation6 + $0x4]]  ;;  %v147_v30 = vstv %s146_s26  ;;  %s717_s6 = sld [smem:[#allocation6 + $0x5]]  ;;  %vm145_vm11 = vcmp.ge.s32.totalorder %v592_v2, %v144_v29  ;;  %v340_v29 = vld [vmem:[#allocation7 + $0x40] sm:$0xff] }
  0x4e   :  { %vm97_vm4 = vmor %vm72_vm9, %vm90_vm0  ;;  %vm124_vm9 = vcmp.ge.s32.totalorder %v582_v1, %v123_v20  ;;  %vm148_vm12 = vcmp.lt.s32.totalorder %v592_v2, %v147_v30  ;;  %s761_s9 = sld [smem:[#allocation3 + $0x6]]  ;;  %v171_v38 = vstv %s654_s20  ;;  %s774_s0 = sld [smem:[#allocation3 + $0x7]]  ;;  %v183_v40 = vstv %s667_s23  ;;  %v341_v30 = vld [vmem:[#allocation7 + $0x48] sm:$0xff] }
  0x4f   :  { %v101_v22 = vsel %vm97_vm4, 0.0, %v99_v16  ;;  %vm688_vm5 = vmand %vm649_vm14, %vm57_vm15  ;;  %s763_s4 = sld [smem:[#allocation4 + $0x6]]  ;;  %s789_s12 = sld [smem:[#allocation4 + $0x7]] }
  0x50   :  { %104 = vst.msk [vmem:[#allocation10] sm:$0xff] %vm103_vm13, %v101_v22  ;;  %vm693_vm7 = vmand %vm65_vm1, %vm69_vm2  ;;  %vm137_vm1 = vcmp.ge.s32.totalorder %v592_v2, %v136_v27  ;;  %vm140_vm2 = vcmp.lt.s32.totalorder %v592_v2, %v139_v28  ;;  %s174_s7 = sadd.s32 %s656_s21, %s654_s20  ;;  %s186_s8 = sadd.s32 %s682_s27, %s667_s23 }
  0x51   :  { %vm73_vm8 = vmor %vm688_vm5, %vm693_vm7  ;;  %v175_v39 = vstv %s174_s7  ;;  %v187_v41 = vstv %s186_s8  ;;  %v196_v47 = vstv %s704_s28  ;;  %s811_s1 = sld [smem:[#allocation5 + $0x6]]  ;;  %v204_v49 = vstv %s715_s30  ;;  %s822_s13 = sld [smem:[#allocation5 + $0x7]] }
  0x52   :  { %vm98_vm14 = vmor %vm73_vm8, %vm90_vm0  ;;  %s813_s2 = sld [smem:[#allocation6 + $0x6]]  ;;  %s824_s14 = sld [smem:[#allocation6 + $0x7]] }
  0x53   :  { %v102_v31 = vsel %vm98_vm14, 0.0, %v100_v25  ;;  %vm726_vm15 = vmand %vm698_vm3, %vm116_vm6  ;;  %vm756_vm3 = vcmp.ge.s32.totalorder %v606_v6, %v111_v18  ;;  %vm117_vm6 = vcmp.lt.s32.totalorder %v606_v6, %v115_v19  ;;  %s198_s10 = sadd.s32 %s706_s29, %s704_s28  ;;  %s206_s11 = sadd.s32 %s717_s6, %s715_s30 }
  0x54   :  { %105 = vst.msk [vmem:[#allocation10 + $0x8] sm:$0xff] %vm103_vm13, %v102_v31  ;;  %vm733_vm4 = vmand %vm124_vm9, %vm128_vm10  ;;  %vm125_vm9 = vcmp.ge.s32.totalorder %v606_v6, %v123_v20  ;;  %vm129_vm10 = vcmp.lt.s32.totalorder %v606_v6, %v127_v21  ;;  %v199_v48 = vstv %s198_s10  ;;  %v207_v50 = vstv %s206_s11  ;;  %s868_s16 = sld [smem:[#allocation3 + $0x8]]  ;;  %s881_s19 = sld [smem:[#allocation3 + $0x9]]  ;;  %v281_v21 = vld [vmem:[#allocation7 + $0x38] sm:$0xff] }
  0x55   :  { %vm132_vm0 = vmor %vm726_vm15, %vm733_vm4  ;;  %vm805_vm15 = vcmp.ge.s32.totalorder %v582_v1, %v171_v38  ;;  %vm176_vm4 = vcmp.lt.s32.totalorder %v582_v1, %v175_v39  ;;  %s234_s3 = sadd.s32 %s763_s4, %s761_s9  ;;  %s246_s15 = sadd.s32 %s789_s12, %s774_s0  ;;  %v231_v58 = vstv %s761_s9  ;;  %v243_v60 = vstv %s774_s0 }
  0x56   :  { %vm745_vm5 = vmand %vm137_vm1, %vm140_vm2  ;;  %s870_s17 = sld [smem:[#allocation4 + $0x8]]  ;;  %v235_v59 = vstv %s234_s3  ;;  %v247_v61 = vstv %s246_s15  ;;  %s896_s21 = sld [smem:[#allocation4 + $0x9]] }
  0x57   :  { %vm751_vm7 = vmand %vm145_vm11, %vm148_vm12  ;;  %vm184_vm12 = vcmp.ge.s32.totalorder %v582_v1, %v183_v40  ;;  %v256_v5 = vstv %s811_s1  ;;  %s918_s22 = sld [smem:[#allocation5 + $0x8]]  ;;  %v264_v8 = vstv %s822_s13  ;;  %s929_s26 = sld [smem:[#allocation5 + $0x9]] }
  0x58   :  { %vm150_vm8 = vmor %vm745_vm5, %vm751_vm7  ;;  %vm205_vm5 = vcmp.ge.s32.totalorder %v592_v2, %v204_v49  ;;  %vm208_vm7 = vcmp.lt.s32.totalorder %v592_v2, %v207_v50  ;;  %s258_s18 = sadd.s32 %s813_s2, %s811_s1  ;;  %s266_s20 = sadd.s32 %s824_s14, %s822_s13 }
  0x59   :  { %vm157_vm14 = vmor %vm132_vm0, %vm150_vm8  ;;  %vm188_vm0 = vcmp.lt.s32.totalorder %v582_v1, %v187_v41  ;;  %v259_v7 = vstv %s258_s18  ;;  %s920_s23 = sld [smem:[#allocation6 + $0x8]]  ;;  %v267_v9 = vstv %s266_s20  ;;  %s931_s27 = sld [smem:[#allocation6 + $0x9]] }
  0x5a   :  { %v162_v42 = vsel %vm157_vm14, 0.0, %v160_v36  ;;  %vm795_vm1 = vmand %vm756_vm3, %vm117_vm6  ;;  %v291_v16 = vstv %s868_s16  ;;  %v303_v18 = vstv %s881_s19  ;;  %s511_s7 = smov [#allocation10]  }
  0x5b   :  { %165 = vst.msk [vmem:[#allocation10 + $0x10] sm:$0xff] %vm103_vm13, %v162_v42  ;;  %vm800_vm2 = vmand %vm125_vm9, %vm129_vm10  ;;  %vm197_vm9 = vcmp.ge.s32.totalorder %v592_v2, %v196_v47  ;;  %vm200_vm10 = vcmp.lt.s32.totalorder %v592_v2, %v199_v48  ;;  %s352_s8 = sshll.u32 %s511_s7, 4  ;;  %s353_s8 = int_to_ptr.vmem [resolvable:$true] %s352_s8 }
  0x5c   :  { %vm133_vm11 = vmor %vm795_vm1, %vm800_vm2  ;;  %s294_s28 = sadd.s32 %s870_s17, %s868_s16  ;;  %s306_s29 = sadd.s32 %s896_s21, %s881_s19 }
  0x5d   :  { %vm158_vm3 = vmor %vm133_vm11, %vm150_vm8  ;;  %v295_v17 = vstv %s294_s28  ;;  %v307_v19 = vstv %s306_s29  ;;  %v316_v22 = vstv %s918_s22  ;;  %v324_v24 = vstv %s929_s26  ;;  %s476_s9 = scalar_lea.vmem %s353_s8, 1280  ;;  %p481_p13 = scmp.lt.s32.totalorder %s353_s8, %s353_s8 }
  0x5e   :  { %v163_v51 = vsel %vm158_vm3, 0.0, %v161_v45  ;;  %vm833_vm6 = vmand %vm805_vm15, %vm176_vm4  ;;  %vm863_vm15 = vcmp.ge.s32.totalorder %v606_v6, %v171_v38  ;;  %vm177_vm4 = vcmp.lt.s32.totalorder %v606_v6, %v175_v39  ;;  %p477_p12 = scmp.ne.s32.totalorder %s353_s8, %s476_s9  ;;  %p482_p0 = scmp.lt.s32.totalorder %s476_s9, %s476_s9 }
  0x5f   :  { %166 = vst.msk [vmem:[#allocation10 + $0x18] sm:$0xff] %vm103_vm13, %v163_v51  ;;  %vm840_vm14 = vmand %vm184_vm12, %vm188_vm0  ;;  %vm185_vm12 = vcmp.ge.s32.totalorder %v606_v6, %v183_v40  ;;  %vm189_vm0 = vcmp.lt.s32.totalorder %v606_v6, %v187_v41  ;;  %s318_s30 = sadd.s32 %s920_s23, %s918_s22  ;;  %s326_s6 = sadd.s32 %s931_s27, %s929_s26 }
  0x60   :  { %vm192_vm8 = vmor %vm833_vm6, %vm840_vm14  ;;  %vm912_vm6 = vcmp.ge.s32.totalorder %v582_v1, %v231_v58  ;;  %vm236_vm14 = vcmp.lt.s32.totalorder %v582_v1, %v235_v59  ;;  %v319_v23 = vstv %s318_s30  ;;  %v327_v25 = vstv %s326_s6  ;;  %p483_p1 = por %p482_p0, %p481_p13 }
  0x61   :  { %vm852_vm1 = vmand %vm197_vm9, %vm200_vm10 }
  0x62   :  { %vm858_vm2 = vmand %vm205_vm5, %vm208_vm7  ;;  %vm244_vm7 = vcmp.ge.s32.totalorder %v582_v1, %v243_v60  ;;  %p484_p2 = pnand %p483_p1, %p477_p12 }
  0x63   :  { %vm210_vm11 = vmor %vm852_vm1, %vm858_vm2  ;;  %vm265_vm1 = vcmp.ge.s32.totalorder %v592_v2, %v264_v8  ;;  %vm268_vm2 = vcmp.lt.s32.totalorder %v592_v2, %v267_v9 }
  0x64   :  { %vm217_vm3 = vmor %vm192_vm8, %vm210_vm11  ;;  %vm248_vm8 = vcmp.lt.s32.totalorder %v582_v1, %v247_v61 }
  0x65   :  { %v222_v62 = vsel %vm217_vm3, 0.0, %v220_v56  ;;  %vm902_vm9 = vmand %vm863_vm15, %vm177_vm4 }
  0x66   :  { %225 = vst.msk [vmem:[#allocation10 + $0x20] sm:$0xff] %vm103_vm13, %v222_v62  ;;  %vm907_vm10 = vmand %vm185_vm12, %vm189_vm0  ;;  %vm257_vm12 = vcmp.ge.s32.totalorder %v592_v2, %v256_v5  ;;  %vm260_vm0 = vcmp.lt.s32.totalorder %v592_v2, %v259_v7 }
  0x67   :  { %vm193_vm5 = vmor %vm902_vm9, %vm907_vm10 }
  0x68   :  { %vm218_vm15 = vmor %vm193_vm5, %vm210_vm11 }
  0x69   :  { %v223_v10 = vsel %vm218_vm15, 0.0, %v221_v3  ;;  %vm940_vm4 = vmand %vm912_vm6, %vm236_vm14  ;;  %vm233_vm6 = vcmp.ge.s32.totalorder %v606_v6, %v231_v58  ;;  %vm237_vm14 = vcmp.lt.s32.totalorder %v606_v6, %v235_v59 }
  0x6a   :  { %226 = vst.msk [vmem:[#allocation10 + $0x28] sm:$0xff] %vm103_vm13, %v223_v10  ;;  %vm947_vm3 = vmand %vm244_vm7, %vm248_vm8  ;;  %vm245_vm7 = vcmp.ge.s32.totalorder %v606_v6, %v243_v60  ;;  %vm249_vm8 = vcmp.lt.s32.totalorder %v606_v6, %v247_v61 }
  0x6b   :  { %vm252_vm11 = vmor %vm940_vm4, %vm947_vm3  ;;  %vm296_vm3 = vcmp.lt.s32.totalorder %v582_v1, %v295_v17 }
  0x6c   :  { %vm959_vm9 = vmand %vm257_vm12, %vm260_vm0  ;;  %vm292_vm0 = vcmp.ge.s32.totalorder %v582_v1, %v291_v16 }
  0x6d   :  { %vm965_vm10 = vmand %vm265_vm1, %vm268_vm2  ;;  %vm304_vm2 = vcmp.ge.s32.totalorder %v582_v1, %v303_v18 }
  0x6e   :  { %vm270_vm5 = vmor %vm959_vm9, %vm965_vm10 }
  0x6f   :  { %vm277_vm15 = vmor %vm252_vm11, %vm270_vm5  ;;  %vm308_vm11 = vcmp.lt.s32.totalorder %v582_v1, %v307_v19 }
  0x70   :  { %v282_v20 = vsel %vm277_vm15, 0.0, %v280_v15  ;;  %vm239_vm4 = vmand %vm233_vm6, %vm237_vm14 }
  0x71   :  { %285 = vst.msk [vmem:[#allocation10 + $0x30] sm:$0xff] %vm103_vm13, %v282_v20  ;;  %vm251_vm12 = vmand %vm245_vm7, %vm249_vm8  ;;  %vm317_vm7 = vcmp.ge.s32.totalorder %v592_v2, %v316_v22  ;;  %vm320_vm8 = vcmp.lt.s32.totalorder %v592_v2, %v319_v23 }
  0x72   :  { %vm253_vm1 = vmor %vm239_vm4, %vm251_vm12  ;;  %vm325_vm4 = vcmp.ge.s32.totalorder %v592_v2, %v324_v24  ;;  %vm328_vm12 = vcmp.lt.s32.totalorder %v592_v2, %v327_v25 }
  0x73   :  { %vm278_vm6 = vmor %vm253_vm1, %vm270_vm5 }
  0x74   :  { %v283_v26 = vsel %vm278_vm6, 0.0, %v281_v21  ;;  %vm1000_vm14 = vmand %vm292_vm0, %vm296_vm3  ;;  %vm293_vm0 = vcmp.ge.s32.totalorder %v606_v6, %v291_v16  ;;  %vm297_vm3 = vcmp.lt.s32.totalorder %v606_v6, %v295_v17 }
  0x75   :  { %286 = vst.msk [vmem:[#allocation10 + $0x38] sm:$0xff] %vm103_vm13, %v283_v26  ;;  %vm310_vm15 = vmand %vm304_vm2, %vm308_vm11  ;;  %vm305_vm2 = vcmp.ge.s32.totalorder %v606_v6, %v303_v18  ;;  %vm309_vm11 = vcmp.lt.s32.totalorder %v606_v6, %v307_v19 }
  0x76   :  { %vm312_vm9 = vmor %vm1000_vm14, %vm310_vm15 }
  0x77   :  { %vm1011_vm10 = vmand %vm317_vm7, %vm320_vm8 }
  0x78   :  { %vm1015_vm5 = vmand %vm325_vm4, %vm328_vm12 }
  0x79   :  { %vm330_vm1 = vmor %vm1011_vm10, %vm1015_vm5 }
  0x7a   :  { %vm337_vm6 = vmor %vm312_vm9, %vm330_vm1 }
  0x7b   :  { %v342_v2 = vsel %vm337_vm6, 0.0, %v340_v29  ;;  %vm299_vm14 = vmand %vm293_vm0, %vm297_vm3 }
  0x7c   :  { %345 = vst.msk [vmem:[#allocation10 + $0x40] sm:$0xff] %vm103_vm13, %v342_v2  ;;  %vm311_vm7 = vmand %vm305_vm2, %vm309_vm11 }
  0x7d   :  { %vm313_vm8 = vmor %vm299_vm14, %vm311_vm7 }
  0x7e   :  { %vm338_vm15 = vmor %vm313_vm8, %vm330_vm1 }
  0x7f   :  { %v343_v31 = vsel %vm338_vm15, 0.0, %v341_v30 }
  0x80   :  { %346 = vst.msk [vmem:[#allocation10 + $0x48] sm:$0xff] %vm103_vm13, %v343_v31 }
  0x81   :  { %487 = shalt.err (!%p484_p2)
}
  0x82   :  { %s488_s0 = scalar_lea.hbm %s1046_s5, 1280 }
  0x83   :  { %p489_p3 = scmp.ne.s32.totalorder %s1046_s5, %s488_s0  ;;  %p492_p4 = scmp.lt.u32.totalorder %s488_s0, %s1046_s5 }
  0x85   :  { %p494_p5 = pnand %p492_p4, %p489_p3 }
  0x87   :  { %497 = shalt.err (!%p494_p5)
}
  0x88   :  { %358 = dma.vmem_to_hbm [thread:$0]  %s353_s8, 1280, %s1046_s5, [#allocation9], %s509_s24, %s509_s24, %s510_s25  }
  0x89   :  { %502 = dma.done.wait [#allocation9], 1280  }
  0x8a   :  { %503 = vsyncadd [#allocation9], 4294966016 }
  0x8b   :  { %362 = vsyncpa [#allocation8], 1 }
  0x8c   :  { %363 = vsyncpa [#allocation9], 1 }

</bundles_post_ra>
